<compile_context>
chip_gen: v5e
topology: v5e:2x2
jax: 0.10.0
libtpu: 0.0.40
codegen_flags: <defaults>
</compile_context>

<pallas_src>
import functools

import numpy as np
import jax
import jax.numpy as jnp
from jax.experimental import pallas as pl
from jax.experimental.pallas import tpu as pltpu


# ----------------------------------------------------------------------------
# Kernel: one (batch, q-tile, head) grid step.
# ----------------------------------------------------------------------------
def _attention_kernel(x_ref, wq_ref, wk_ref, wv_ref, wp_ref, bp_ref,
                      o_ref, acc_ref, *, q_tile, compute_dtype, approx_recip):
    """
    x_ref   : (N, C)   full token sequence (keys/values source), compute dtype
    wq_ref  : (C, c)   this head's q-projection columns (1/sqrt(c) pre-folded)
    wk_ref  : (C, c)   this head's k-projection columns
    wv_ref  : (C, c)   this head's v-projection columns
    wp_ref  : (c, C)   this head's rows of the output projection
    bp_ref  : (1, C)   output projection bias (f32)
    o_ref   : (tq, C)  output tile (lane-dense; written on the last head step)
    acc_ref : (tq, C)  f32 accumulator for sum_h (attn_h @ v_h) @ Wp_h
    """
    qi = pl.program_id(1)
    head = pl.program_id(2)

    @pl.when(head == 0)
    def _init():
        acc_ref[...] = jnp.zeros_like(acc_ref)

    # Query rows of this tile + the full sequence (keys are not tiled: the
    # softmax is over all N keys, exactly like the reference).
    i0 = pl.multiple_of(qi * q_tile, q_tile)
    x_q = x_ref[pl.ds(i0, q_tile), :]                       # (tq, C)
    x_all = x_ref[...]                                      # (N, C)

    # Per-head projections straight from the full-tile weight blocks handed
    # over by the BlockSpecs (no in-kernel lane slicing / stack / concat).
    # MXU operands are `compute_dtype`; accumulation is f32.
    q = jnp.dot(x_q, wq_ref[...], preferred_element_type=jnp.float32)    # (tq, c)
    k = jnp.dot(x_all, wk_ref[...], preferred_element_type=jnp.float32)  # (N, c)
    v = jnp.dot(x_all, wv_ref[...], preferred_element_type=jnp.float32)  # (N, c)

    # Scores for this q-tile against all keys (scale already folded into wq).
    s = jnp.einsum('nc,mc->nm',
                   q.astype(compute_dtype), k.astype(compute_dtype),
                   preferred_element_type=jnp.float32)      # (tq, N) f32

    # Numerically stable softmax with *deferred* normalization: keep the
    # unnormalized exp and rescale the (tq, c) PV result instead of dividing
    # the (tq, N) scores.  All softmax statistics stay in f32.
    s = s - jnp.max(s, axis=-1, keepdims=True)
    e = jnp.exp(s)                                          # (tq, N) f32
    l = jnp.sum(e, axis=-1, keepdims=True)                  # (tq, 1) f32

    o_h = jnp.dot(e.astype(compute_dtype), v.astype(compute_dtype),
                  preferred_element_type=jnp.float32)       # (tq, c) f32
    o_h = o_h * pl.reciprocal(l, approx=approx_recip)

    # Output projection folded into a per-head accumulation:
    #   out = sum_h o_h @ Wp[h*c:(h+1)*c, :]
    # so the only stored tile is the lane-dense (tq, C) block.
    acc_ref[...] += jnp.dot(o_h.astype(compute_dtype), wp_ref[...],
                            preferred_element_type=jnp.float32)

    @pl.when(head == pl.num_programs(2) - 1)
    def _finalize():
        o_ref[...] = (acc_ref[...] + bp_ref[...]).astype(o_ref.dtype)


# ----------------------------------------------------------------------------
# Wrapper.
# ----------------------------------------------------------------------------
def _choose_q_tile(N):
    """256-multiples feed the v6e/v7x 256x256 MXU; 128 suffices on v5e."""
    for t in (512, 448, 384, 320, 256, 128):
        if N % t == 0:
            return t
    hi = min(N, 512)
    for t in range(hi - hi % 8, 7, -8):     # largest multiple-of-8 divisor
        if N % t == 0:
            return t
    return N


def attention_forward(x, H, W, params, num_heads, sr_ratio=1,
                      compute_dtype=jnp.bfloat16, q_tile=None):
    """Forward pass of the PyTorch `Attention` module (sr_ratio == 1 path)."""
    if sr_ratio != 1:
        # TODO(synk): strided Conv2d + LayerNorm spatial-reduction kv path.
        raise NotImplementedError("sr_ratio > 1 path not implemented")

    B, N, C = x.shape
    assert H * W == N, "token count must equal H * W"
    assert C % num_heads == 0
    h = num_heads
    c = C // h
    scale = c ** -0.5
    cdt = jnp.dtype(compute_dtype)

    tq = q_tile if q_tile is not None else _choose_q_tile(N)
    assert N % tq == 0, f"q_tile={tq} must divide N={N}"
    num_q_tiles = N // tq

    # ---- wrapper-side weight packing (runs once in XLA, outside the kernel) --
    # Fold 1/sqrt(head_dim) into Wq, then lay the weights out head-major so a
    # BlockSpec hands each grid step a full (C, c) / (c, C) tile and the kernel
    # never slices or concatenates heads.
    wq = params["wq"].astype(jnp.float32) * scale
    wk = params["wkv"][:, :C]
    wv = params["wkv"][:, C:]
    wq3 = wq.reshape(C, h, c).transpose(1, 0, 2).astype(cdt)           # (h, C, c)
    wk3 = wk.reshape(C, h, c).transpose(1, 0, 2).astype(cdt)           # (h, C, c)
    wv3 = wv.reshape(C, h, c).transpose(1, 0, 2).astype(cdt)           # (h, C, c)
    wp3 = params["wp"].reshape(h, c, C).astype(cdt)                    # (h, c, C)
    bp = params["bp"].reshape(1, C).astype(jnp.float32)                # f32 bias
    x_in = x.astype(cdt)

    # ---- explicit scoped-VMEM budget (defaults: 16 MiB v5e / 32 MiB v6e+v7x) -
    ib, cb, f32b = x_in.dtype.itemsize, cdt.itemsize, 4
    est = (2 * N * C * ib                         # x block (double-buffered)
           + 2 * (3 * C * c + c * C) * cb         # per-head weight blocks
           + 2 * tq * C * x.dtype.itemsize        # output block
           + tq * C * f32b                        # f32 accumulator scratch
           + (tq * c + 2 * N * c) * (f32b + cb)   # q / k / v (+ operand casts)
           + 3 * tq * N * f32b                    # scores / exp / temporaries
           + tq * N * cb)                         # exp cast fed to PV matmul
    vmem_limit = int(min(max(2 * est, 32 * 2**20), 48 * 2**20))   # <=48MiB: v7x

    kernel = functools.partial(
        _attention_kernel, q_tile=tq, compute_dtype=cdt,
        approx_recip=(cdt != jnp.dtype(jnp.float32)))

    return pl.pallas_call(
        kernel,
        out_shape=jax.ShapeDtypeStruct((B, N, C), x.dtype),
        grid=(B, num_q_tiles, h),
        in_specs=[
            pl.BlockSpec((None, N, C), lambda b, q, hh: (b, 0, 0)),    # x
            pl.BlockSpec((None, C, c), lambda b, q, hh: (hh, 0, 0)),   # wq head
            pl.BlockSpec((None, C, c), lambda b, q, hh: (hh, 0, 0)),   # wk head
            pl.BlockSpec((None, C, c), lambda b, q, hh: (hh, 0, 0)),   # wv head
            pl.BlockSpec((None, c, C), lambda b, q, hh: (hh, 0, 0)),   # wp head
            pl.BlockSpec((1, C), lambda b, q, hh: (0, 0)),             # bias
        ],
        out_specs=pl.BlockSpec((None, tq, C), lambda b, q, hh: (b, q, 0)),
        scratch_shapes=[pltpu.VMEM((tq, C), jnp.float32)],
        compiler_params=pltpu.CompilerParams(
            dimension_semantics=("parallel", "parallel", "arbitrary"),
            vmem_limit_bytes=vmem_limit),
    )(x_in, wq3, wk3, wv3, wp3, bp)


# ----------------------------------------------------------------------------
# Pure-JAX reference (semantics of the PyTorch forward, sr_ratio=1).
# ----------------------------------------------------------------------------
def reference(x, params, num_heads):
    B, N, C = x.shape
    h = num_heads
    c = C // h
    scale = c ** -0.5

    q = x @ params["wq"]
    kv = x @ params["wkv"]
    k, v = kv[..., :C], kv[..., C:]

    def split(t):                                    # 'b n (h c) -> b h n c'
        return t.reshape(B, N, h, c).transpose(0, 2, 1, 3)

    qh, kh, vh = split(q), split(k), split(v)
    attn = jnp.einsum('bhnc,bhmc->bhnm', qh, kh) * scale
    attn = jax.nn.softmax(attn, axis=-1)
    out = jnp.einsum('bhnm,bhmc->bhnc', attn, vh)
    out = out.transpose(0, 2, 1, 3).reshape(B, N, C)
    return out @ params["wp"] + params["bp"]


# ----------------------------------------------------------------------------
if __name__ == "__main__":
    # Small config consistent with the module: dim=32, num_heads=8, 4x4 tokens.
    B, C = 2, 32
    H = W = 4
    N = H * W
    num_heads = 8

    key = jax.random.PRNGKey(0)
    ks = jax.random.split(key, 5)
    params = {
        "wq":  jax.random.normal(ks[0], (C, C), jnp.float32) * 0.1,      # q.weight^T
        "wkv": jax.random.normal(ks[1], (C, 2 * C), jnp.float32) * 0.1,  # kv.weight^T
        "wp":  jax.random.normal(ks[2], (C, C), jnp.float32) * 0.1,      # proj.weight^T
        "bp":  jax.random.normal(ks[3], (1, C), jnp.float32) * 0.1,      # proj.bias
    }
    x = jax.random.normal(ks[4], (B, N, C), jnp.float32)

    ref = reference(x, params, num_heads)

    # 1) f32 MXU operands + explicit q-tiling (2 q-tiles): tight check against
    #    the pure-JAX reference (exercises the multi-tile grid path).
    out_f32 = jax.block_until_ready(
        attention_forward(x, H, W, params, num_heads,
                          compute_dtype=jnp.float32, q_tile=8))
    np.testing.assert_allclose(np.asarray(out_f32), np.asarray(ref),
                               rtol=1e-4, atol=1e-4)

    # 2) bf16 MXU operands (production config), default q-tile: looser check
    #    since operand rounding is bf16 (accumulation and softmax stats are f32).
    out_bf16 = jax.block_until_ready(
        attention_forward(x, H, W, params, num_heads,
                          compute_dtype=jnp.bfloat16))
    np.testing.assert_allclose(np.asarray(out_bf16), np.asarray(ref),
                               rtol=5e-2, atol=5e-2)

    print("KERNEL_OK")
</pallas_src>

<mosaic_0001>
module attributes {stable_mosaic.version = 11 : i64} {
  func.func @_attention_kernel(%arg0: i32, %arg1: i32, %arg2: i32, %arg3: memref<1x16x32xf32, #tpu.memory_space<vmem>>, %arg4: memref<1x32x4xf32, #tpu.memory_space<vmem>>, %arg5: memref<1x32x4xf32, #tpu.memory_space<vmem>>, %arg6: memref<1x32x4xf32, #tpu.memory_space<vmem>>, %arg7: memref<1x4x32xf32, #tpu.memory_space<vmem>>, %arg8: memref<1x32xf32, #tpu.memory_space<vmem>>, %arg9: memref<1x8x32xf32, #tpu.memory_space<vmem>>, %arg10: memref<8x32xf32, #tpu.memory_space<vmem>>) attributes {dimension_semantics = [#tpu.dimension_semantics<parallel>, #tpu.dimension_semantics<parallel>, #tpu.dimension_semantics<arbitrary>], iteration_bounds = array<i64: 2, 2, 8>, scalar_prefetch = 0 : i64, scratch_operands = 1 : i64, tpu.core_type = #tpu.core_type<tc>, window_params = [{transform_indices = @transform_0, window_bounds = array<i64: 1, 16, 32>}, {transform_indices = @transform_1, window_bounds = array<i64: 1, 32, 4>}, {transform_indices = @transform_2, window_bounds = array<i64: 1, 32, 4>}, {transform_indices = @transform_3, window_bounds = array<i64: 1, 32, 4>}, {transform_indices = @transform_4, window_bounds = array<i64: 1, 4, 32>}, {pipeline_mode = #tpu.pipeline_mode<synchronous>, transform_indices = @transform_5, window_bounds = array<i64: 1, 32>}, {transform_indices = @transform_6, window_bounds = array<i64: 1, 8, 32>}]} {
    %c0_i32 = arith.constant 0 : i32
    %0 = arith.cmpi eq, %arg2, %c0_i32 : i32
    %1 = arith.extui %0 : i1 to i32
    %c0_i32_0 = arith.constant 0 : i32
    %2 = arith.cmpi ne, %1, %c0_i32_0 : i32
    scf.if %2 {
      %cst_29 = arith.constant 0.000000e+00 : f32
      %40 = vector.broadcast %cst_29 : f32 to vector<8x32xf32>
      %c0_30 = arith.constant 0 : index
      %c0_31 = arith.constant 0 : index
      %41 = vector.load %arg10[%c0_30, %c0_31] : memref<8x32xf32, #tpu.memory_space<vmem>>, vector<8x32xf32>
      tpu.vector_store %arg10[%c0_30, %c0_31], %40 {strides = array<i32>} : memref<8x32xf32, #tpu.memory_space<vmem>>, vector<8x32xf32>,
    } else {
    }
    %c8_i32 = arith.constant 8 : i32
    %3 = arith.muli %arg1, %c8_i32 : i32
    %4 = tpu.assume_multiple %3, 8 : i32
    %c0 = arith.constant 0 : index
    %5 = arith.index_cast %4 : i32 to index
    %c0_1 = arith.constant 0 : index
    %6 = vector.load %arg3[%c0, %5, %c0_1] : memref<1x16x32xf32, #tpu.memory_space<vmem>>, vector<1x8x32xf32>
    %7 = vector.shape_cast %6 : vector<1x8x32xf32> to vector<8x32xf32>
    %c0_2 = arith.constant 0 : index
    %c0_3 = arith.constant 0 : index
    %c0_4 = arith.constant 0 : index
    %8 = vector.load %arg3[%c0_2, %c0_3, %c0_4] : memref<1x16x32xf32, #tpu.memory_space<vmem>>, vector<1x16x32xf32>
    %9 = vector.shape_cast %8 : vector<1x16x32xf32> to vector<16x32xf32>
    %c0_5 = arith.constant 0 : index
    %c0_6 = arith.constant 0 : index
    %c0_7 = arith.constant 0 : index
    %10 = vector.load %arg4[%c0_5, %c0_6, %c0_7] : memref<1x32x4xf32, #tpu.memory_space<vmem>>, vector<1x32x4xf32>
    %11 = vector.shape_cast %10 : vector<1x32x4xf32> to vector<32x4xf32>
    %cst = arith.constant dense<0.000000e+00> : vector<8x4xf32>
    %12 = tpu.matmul %7, %11, %cst {dimension_numbers = #tpu.dot_dimension_numbers<[1], [0], [0], [1], [0, 0, 1, 1], [], []>} : vector<8x32xf32>, vector<32x4xf32>, vector<8x4xf32> -> vector<8x4xf32>
    %c0_8 = arith.constant 0 : index
    %c0_9 = arith.constant 0 : index
    %c0_10 = arith.constant 0 : index
    %13 = vector.load %arg5[%c0_8, %c0_9, %c0_10] : memref<1x32x4xf32, #tpu.memory_space<vmem>>, vector<1x32x4xf32>
    %14 = vector.shape_cast %13 : vector<1x32x4xf32> to vector<32x4xf32>
    %cst_11 = arith.constant dense<0.000000e+00> : vector<16x4xf32>
    %15 = tpu.matmul %9, %14, %cst_11 {dimension_numbers = #tpu.dot_dimension_numbers<[1], [0], [0], [1], [0, 0, 1, 1], [], []>} : vector<16x32xf32>, vector<32x4xf32>, vector<16x4xf32> -> vector<16x4xf32>
    %c0_12 = arith.constant 0 : index
    %c0_13 = arith.constant 0 : index
    %c0_14 = arith.constant 0 : index
    %16 = vector.load %arg6[%c0_12, %c0_13, %c0_14] : memref<1x32x4xf32, #tpu.memory_space<vmem>>, vector<1x32x4xf32>
    %17 = vector.shape_cast %16 : vector<1x32x4xf32> to vector<32x4xf32>
    %cst_15 = arith.constant dense<0.000000e+00> : vector<16x4xf32>
    %18 = tpu.matmul %9, %17, %cst_15 {dimension_numbers = #tpu.dot_dimension_numbers<[1], [0], [0], [1], [0, 0, 1, 1], [], []>} : vector<16x32xf32>, vector<32x4xf32>, vector<16x4xf32> -> vector<16x4xf32>
    "tpu.trace_start"() <{level = 10 : i32, message = "nc,mc->nm"}> : () -> ()
    %cst_16 = arith.constant dense<0.000000e+00> : vector<8x16xf32>
    %19 = tpu.matmul %12, %15, %cst_16 {dimension_numbers = #tpu.dot_dimension_numbers<[1], [1], [0], [0], [0, 0, 1, 0], [], []>} : vector<8x4xf32>, vector<16x4xf32>, vector<8x16xf32> -> vector<8x16xf32>
    "tpu.trace_stop"() : () -> ()
    %cst_17 = arith.constant dense<0xFF800000> : vector<8xf32>
    %20 = vector.multi_reduction <maximumf>, %19, %cst_17 [1] : vector<8x16xf32> to vector<8xf32>
    %21 = vector.shape_cast %20 : vector<8xf32> to vector<8x1xf32>
    %22 = vector.broadcast %21 : vector<8x1xf32> to vector<8x16xf32>
    %23 = arith.subf %19, %22 : vector<8x16xf32>
    %24 = math.exp %23 : vector<8x16xf32>
    %cst_18 = arith.constant dense<0.000000e+00> : vector<8xf32>
    %25 = vector.multi_reduction <add>, %24, %cst_18 [1] : vector<8x16xf32> to vector<8xf32>
    %26 = vector.shape_cast %25 : vector<8xf32> to vector<8x1xf32>
    %cst_19 = arith.constant dense<0.000000e+00> : vector<8x4xf32>
    %27 = tpu.matmul %24, %18, %cst_19 {dimension_numbers = #tpu.dot_dimension_numbers<[1], [0], [0], [1], [0, 0, 1, 1], [], []>} : vector<8x16xf32>, vector<16x4xf32>, vector<8x4xf32> -> vector<8x4xf32>
    %28 = tpu.reciprocal %26 : vector<8x1xf32> -> vector<8x1xf32>
    %29 = vector.broadcast %28 : vector<8x1xf32> to vector<8x4xf32>
    %30 = arith.mulf %27, %29 : vector<8x4xf32>
    %c0_20 = arith.constant 0 : index
    %c0_21 = arith.constant 0 : index
    %31 = vector.load %arg10[%c0_20, %c0_21] : memref<8x32xf32, #tpu.memory_space<vmem>>, vector<8x32xf32>
    %c0_22 = arith.constant 0 : index
    %c0_23 = arith.constant 0 : index
    %c0_24 = arith.constant 0 : index
    %32 = vector.load %arg7[%c0_22, %c0_23, %c0_24] : memref<1x4x32xf32, #tpu.memory_space<vmem>>, vector<1x4x32xf32>
    %33 = vector.shape_cast %32 : vector<1x4x32xf32> to vector<4x32xf32>
    %cst_25 = arith.constant dense<0.000000e+00> : vector<8x32xf32>
    %34 = tpu.matmul %30, %33, %cst_25 {dimension_numbers = #tpu.dot_dimension_numbers<[1], [0], [0], [1], [0, 0, 1, 1], [], []>} : vector<8x4xf32>, vector<4x32xf32>, vector<8x32xf32> -> vector<8x32xf32>
    %35 = arith.addf %31, %34 : vector<8x32xf32>
    %c0_26 = arith.constant 0 : index
    %c0_27 = arith.constant 0 : index
    %36 = vector.load %arg10[%c0_26, %c0_27] : memref<8x32xf32, #tpu.memory_space<vmem>>, vector<8x32xf32>
    tpu.vector_store %arg10[%c0_26, %c0_27], %35 {strides = array<i32>} : memref<8x32xf32, #tpu.memory_space<vmem>>, vector<8x32xf32>,
    %c7_i32 = arith.constant 7 : i32
    %37 = arith.cmpi eq, %arg2, %c7_i32 : i32
    %38 = arith.extui %37 : i1 to i32
    %c0_i32_28 = arith.constant 0 : i32
    %39 = arith.cmpi ne, %38, %c0_i32_28 : i32
    scf.if %39 {
      %c0_29 = arith.constant 0 : index
      %c0_30 = arith.constant 0 : index
      %40 = vector.load %arg10[%c0_29, %c0_30] : memref<8x32xf32, #tpu.memory_space<vmem>>, vector<8x32xf32>
      %c0_31 = arith.constant 0 : index
      %c0_32 = arith.constant 0 : index
      %41 = vector.load %arg8[%c0_31, %c0_32] : memref<1x32xf32, #tpu.memory_space<vmem>>, vector<1x32xf32>
      %42 = vector.broadcast %41 : vector<1x32xf32> to vector<8x32xf32>
      %43 = arith.addf %40, %42 : vector<8x32xf32>
      %c0_33 = arith.constant 0 : index
      %c0_34 = arith.constant 0 : index
      %c0_35 = arith.constant 0 : index
      %44 = vector.load %arg9[%c0_33, %c0_34, %c0_35] : memref<1x8x32xf32, #tpu.memory_space<vmem>>, vector<1x8x32xf32>
      %45 = vector.shape_cast %44 : vector<1x8x32xf32> to vector<8x32xf32>
      %46 = vector.shape_cast %43 : vector<8x32xf32> to vector<1x8x32xf32>
      tpu.vector_store %arg9[%c0_33, %c0_34, %c0_35], %46 {strides = array<i32>} : memref<1x8x32xf32, #tpu.memory_space<vmem>>, vector<1x8x32xf32>,
    } else {
    }
    return
  }
  func.func @transform_0(%arg0: i32, %arg1: i32, %arg2: i32) -> (i32, i32, i32) {
    %c0_i32 = arith.constant 0 : i32
    %c0_i32_0 = arith.constant 0 : i32
    %c0_i32_1 = arith.constant 0 : i32
    return %arg0, %c0_i32, %c0_i32_0 : i32, i32, i32
  }
  func.func @transform_1(%arg0: i32, %arg1: i32, %arg2: i32) -> (i32, i32, i32) {
    %c0_i32 = arith.constant 0 : i32
    %c0_i32_0 = arith.constant 0 : i32
    %c0_i32_1 = arith.constant 0 : i32
    return %arg2, %c0_i32, %c0_i32_0 : i32, i32, i32
  }
  func.func @transform_2(%arg0: i32, %arg1: i32, %arg2: i32) -> (i32, i32, i32) {
    %c0_i32 = arith.constant 0 : i32
    %c0_i32_0 = arith.constant 0 : i32
    %c0_i32_1 = arith.constant 0 : i32
    return %arg2, %c0_i32, %c0_i32_0 : i32, i32, i32
  }
  func.func @transform_3(%arg0: i32, %arg1: i32, %arg2: i32) -> (i32, i32, i32) {
    %c0_i32 = arith.constant 0 : i32
    %c0_i32_0 = arith.constant 0 : i32
    %c0_i32_1 = arith.constant 0 : i32
    return %arg2, %c0_i32, %c0_i32_0 : i32, i32, i32
  }
  func.func @transform_4(%arg0: i32, %arg1: i32, %arg2: i32) -> (i32, i32, i32) {
    %c0_i32 = arith.constant 0 : i32
    %c0_i32_0 = arith.constant 0 : i32
    %c0_i32_1 = arith.constant 0 : i32
    return %arg2, %c0_i32, %c0_i32_0 : i32, i32, i32
  }
  func.func @transform_5(%arg0: i32, %arg1: i32, %arg2: i32) -> (i32, i32) {
    %c0_i32 = arith.constant 0 : i32
    %c0_i32_0 = arith.constant 0 : i32
    %c0_i32_1 = arith.constant 0 : i32
    return %c0_i32, %c0_i32_0 : i32, i32
  }
  func.func @transform_6(%arg0: i32, %arg1: i32, %arg2: i32) -> (i32, i32, i32) {
    %c0_i32 = arith.constant 0 : i32
    %c0_i32_0 = arith.constant 0 : i32
    return %arg0, %arg1, %c0_i32 : i32, i32, i32
  }
}

</mosaic_0001>

<bundles_post_ra>
// kernel: tpu_custom_call.1
= control target key start
LH: loop header
LB: loop body
LE: loop exit
PB: predicated region body
PF: predicated region fallthrough
CT: control target
= control target key end

     0   :  { %11 = vsyncpa [#allocation4], 0  ;;  %s1188_s0 = inlined_call_operand.vmem [shape: f32[2,16,32], index: 0, kind: input, shape index: {}]   ;;  %s1189_s1 = inlined_call_operand.vmem [shape: f32[8,32,4], index: 1, kind: input, shape index: {}]   ;;  %s1190_s2 = inlined_call_operand.vmem [shape: f32[8,32,4], index: 2, kind: input, shape index: {}]   ;;  %s1191_s3 = inlined_call_operand.vmem [shape: f32[8,32,4], index: 3, kind: input, shape index: {}]   ;;  %s1192_s4 = inlined_call_operand.vmem [shape: f32[8,4,32], index: 4, kind: input, shape index: {}]   ;;  %s1193_s5 = inlined_call_operand.vmem [shape: f32[1,32], index: 5, kind: input, shape index: {}]   ;;  %s1194_s6 = inlined_call_operand.hbm [shape: f32[2,16,32], index: 6, kind: output, shape index: {}]  }
   0x1   :  { %13 = vsyncpa [#allocation4 + $0x1], 0  ;;  %s992_s21 = smov 0   ;;  %s994_s22 = smov 0  }
   0x2   :  { %s996_s23 = smov 0   ;;  %s998_s24 = smov 0  }
   0x3   :  { %s1000_s25 = smov 0   ;;  %s1002_s26 = smov 0  }
   0x4   :  { %s1004_s27 = smov 0   ;;  %s1006_s28 = smov 0  }
   0x5   :  { %s1008_s29 = smov 0   ;;  %s1010_s30 = smov 0  }
   0x6 LB: > { %1206 = sst [smem:[#allocation6_spill]] %s918_s21  ;;  %s713_s7 = sadd.s32 4294967295, %s954_s30   ;;  %s954_s30 = sphi %s1010_s30, %s19_s30   ;;  %s950_s29 = sphi %s1008_s29, %s1233_s29   ;;  %s946_s28 = sphi %s1006_s28, %s1229_s28   ;;  %s942_s27 = sphi %s1004_s27, %s1228_s27   ;;  %s938_s26 = sphi %s1002_s26, %s1227_s26   ;;  %s934_s25 = sphi %s1000_s25, %s1226_s25   ;;  %s930_s24 = sphi %s998_s24, %s1225_s24   ;;  %s926_s23 = sphi %s996_s23, %s1224_s23   ;;  %s922_s22 = sphi %s994_s22, %s1232_s22   ;;  %s918_s21 = sphi %s992_s21, %s1231_s21  }
   0x7   : > { %1207 = sst [smem:[#allocation7_spill]] %s926_s23  ;;  %s714_s8 = sadd.s32 4294967294, %s954_s30  }
   0x8   : > { %1208 = sst [smem:[#allocation8_spill]] %s942_s27  ;;  %s31_s9 = sadd.s32 1, %s942_s27 }
   0x9   : > { %1209 = sst [smem:[#allocation9_spill]] %s946_s28  ;;  %p32_p0 = scmp.ge.s32.totalorder %s31_s9, 8 }
   0xa   : > { %1210 = sst [smem:[#allocation10_spill]] %s950_s29  ;;  %s34_s10 = sadd.s32 1, %s946_s28 }
   0xb   : > { %1211 = sst [smem:[#allocation11_spill]] %s954_s30  ;;  %s38_s11 = sadd.s32 1, %s950_s29 }
   0xc   : > { %p208_p1 = scmp.ne.s32.totalorder %s926_s23, %s922_s22  ;;  %s1235_s9 = smov (%p32_p0, %s31_s9), 0 }
   0xd   : > { %1212 = sst [smem:[#allocation12_spill]] %s1235_s9  ;;  %s1237_s10 = smov (!%p32_p0, %s34_s10), %s946_s28 }
   0xe   : > { %p209_p2 = scmp.eq.s32.totalorder %s713_s7, 31  ;;  %p214_p3 = scmp.ne.s32.totalorder %s922_s22, %s918_s21 }
   0xf   : > { %p36_p4 = scmp.ge.s32.totalorder %s1237_s10, 2  ;;  %p215_p5 = scmp.eq.s32.totalorder %s714_s8, 31 }
  0x10   : > { %p1054_p6 = por %p209_p2, %p208_p1  ;;  %p717_p8 = scmp.ge.s32.totalorder %s954_s30, 1 }
  0x11   : > { %s1239_s10 = smov (%p36_p4, %s1237_s10), 0  ;;  %s1241_s11 = smov (!%p36_p4, %s38_s11), %s950_s29 }
  0x12   : > { %1214 = sst [smem:[#allocation13_spill]] %s1239_s10  ;;  %p1061_p7 = por %p215_p5, %p214_p3 }
  0x13   : > { %p40_p9 = scmp.ge.s32.totalorder %s1241_s11, 2  ;;  %p275_p10 = scmp.lt.s32.totalorder %s954_s30, 33 }
  0x14   : > { %s1215_s13 = scalar_select %p1061_p7, 1, 0 }
  0x15   : > { %s194_s14 = ssub.s32 %s946_s28, %s1239_s10  ;;  %s1243_s11 = smov (%p40_p9, %s1241_s11), 0 }
  0x16   : > { %1216 = sst [smem:[#allocation14_spill]] %s1215_s13  ;;  %p276_p11 = pnand %p717_p8, %p275_p10 }
  0x17   : > { %1217 = sst [smem:[#allocation15_spill]] %s1243_s11  ;;  %s193_s15 = ssub.s32 %s950_s29, %s1243_s11 }
  0x18   : > { %s195_s16 = sor.u32 %s194_s14, %s193_s15  ;;  %s198_s17 = sadd.s32 1, %s926_s23 }
  0x19   : > { %p196_p12 = scmp.eq.s32.totalorder %s195_s16, 0  ;;  %279 = sbr.rel (%p276_p11) target bundleno = 750 (0x2ee), region = 44 }
  0x1a   : > { %s1200_s19 = sand.u32 (!%p276_p11), 1, %s922_s22   ;;  %p324_p13 = scmp.lt.s32.totalorder (!%p276_p11), %s938_s26, 1 }
  0x1b   : > { %s1075_s18 = scalar_select %p196_p12, %s926_s23, %s198_s17  }
  0x1c   : > { %s1081_s20 = sshll.u32 (!%p276_p11), %s1200_s19, 3  ;;  %p329_p0 = scmp.lt.s32.totalorder (!%p276_p11), %s930_s24, 7 }
  0x1d   : > { %1218 = sst [smem:[#allocation16_spill]] %s1075_s18  ;;  %s323_s15 = scalar_lea.vmem (!%p276_p11), [#allocation3], %s1081_s20 }
  0x1e   : > { %s325_s7 = scalar_select %p324_p13, %s938_s26, 1 }
  0x1f   : > { %s330_s8 = scalar_select %p329_p0, %s930_s24, 7 }
  0x20   : > { %s747_s14 = sshll.u32 %s325_s7, 4  ;;  %p728_p1 = scmp.ne.s32.totalorder %s930_s24, 0 }
  0x21   : > { %s1089_s17 = scalar_lea.vmem %s1188_s0, %s747_s14  ;;  %s748_s11 = sshll.u32 %s330_s8, 5 }
  0x22   : > { %s333_s29 = scalar_lea.vmem %s1189_s1, %s748_s11  ;;  %s338_s19 = scalar_lea.vmem %s1190_s2, %s748_s11 }
  0x23   : > { %s1100_s13 = scalar_lea.vmem %s1191_s3, %s748_s11  ;;  %s727_s7 = sshll.u32 %s330_s8, 2 }
  0x24   : > { %s1105_s14 = scalar_lea.vmem %s1192_s4, %s727_s7  ;;  %351 = sbr.rel (%p728_p1) target bundleno = 43 (0x2b), region = 48 }
  0x29   : > { %vm352_vm0 = vcmask 261120   ;;  %v956_v0 = vmov 0.0  }
  0x2a   : > { %353 = vst.msk [vmem:[#allocation2] sm:$0xff] %vm352_vm0, %v956_v0 }
  0x2b PF: > { %v390_v1 = vld [vmem:[%s338_s19 + $0x18] sm:$0xff]  ;;  %v389_v2 = vld [vmem:[%s338_s19 + $0x10] sm:$0xff]  ;;  %s729_s23 = sshll.u32 %s934_s25, 3  ;;  %v388_v4 = vld [vmem:[%s338_s19 + $0x8] sm:$0xff]  ;;  %vm363_vm1 = vcmask 261120   ;;  %vm447_vm2 = vcmask 31744  }
  0x2c   : > { %409 = vmatpush.msra.mxu1 %v390_v1  ;;  %v362_v3 = vld [vmem:[%s333_s29 + $0x18] sm:$0xff]  ;;  %v361_v5 = vld [vmem:[%s333_s29 + $0x10] sm:$0xff]  ;;  %v360_v6 = vld [vmem:[%s333_s29 + $0x8] sm:$0xff]  ;;  %s355_s21 = scalar_lea.vmem %s1089_s17, %s729_s23  ;;  %vm477_vm3 = vcmask 130048   ;;  %vm530_vm4 = vcmask 1043456   ;;  %p741_p2 = scmp.ne.s32.totalorder %s930_s24, 7 }
  0x2d   : > { %379 = vmatpush.msra.mxu0 %v362_v3  ;;  %v387_v7 = vld [vmem:[%s338_s19] sm:$0xff]  ;;  %v358_v11 = vld [vmem:[%s1089_s17 + $0x8] sm:$0xff]  ;;  %v423_v12 = vld [vmem:[%s1100_s13 + $0x18] sm:$0xff] }
  0x2e   : > { %410 = vmatpush.msra.mxu1 %v389_v2  ;;  %v357_v8 = vld [vmem:[%s1089_s17] sm:$0xff]  ;;  %v422_v13 = vld [vmem:[%s1100_s13 + $0x10] sm:$0xff]  ;;  %436 = vmatpush.msra.mxu2 %v423_v12  ;;  %v421_v14 = vld [vmem:[%s1100_s13 + $0x8] sm:$0xff] }
  0x2f   : > { %380 = vmatpush.msra.mxu0 %v361_v5  ;;  %v359_v9 = vld [vmem:[%s333_s29] sm:$0xff] }
  0x30   : > { %411 = vmatpush.msra.mxu1 %v388_v4  ;;  %v356_v10 = vld [vmem:[%s355_s21] sm:$0xff]  ;;  %437 = vmatpush.msra.mxu2 %v422_v13 }
  0x31   : > { %381 = vmatpush.msra.mxu0 %v360_v6  ;;  %v420_v15 = vld [vmem:[%s1100_s13] sm:$0xff] }
  0x32   : > { %412 = vmatpush.msra.mxu1 %v387_v7  ;;  %438 = vmatpush.msra.mxu2 %v421_v14  ;;  %v526_v28 = vld [vmem:[%s1105_s14] sm:$0xf] }
  0x33   : > { %731 = vmatmul.msk.f32.vlgmr.msra.gmra.mxu1 %vm363_vm1, %v357_v8  ;;  %382 = vmatpush.msra.mxu0 %v359_v9  ;;  %v525_v42 = vld [vmem:[#allocation2] sm:$0xff] }
  0x34   : > { %730 = vmatmul.msk.f32.vlgmr.msra.gmra.mxu0 %vm363_vm1, %v356_v10  ;;  %439 = vmatpush.msra.mxu2 %v420_v15 }
  0x35   : > { %733 = vmatmul.msk.f32.vlgmr.msra.gmra.mxu2 %vm363_vm1, %v357_v8 }
  0x3b   : > { %732 = vmatmul.msk.f32.gmra.mxu1 %vm363_vm1, %v358_v11 }
  0x3d   : > { %734 = vmatmul.msk.f32.gmra.mxu2 %vm363_vm1, %v358_v11 }
  0xb0   : > { %v414_v16 = vpop.f32.mrf.mxu1 }
  0xb1   : > { %v384_v18 = vpop.f32.mrf.mxu0 }
  0xb8   : > { %v417_v17 = vpop.f32.mrf.mxu1  ;;  %v441_v21 = vpop.f32.mrf.mxu2 }
  0xb9   : > { %735 = vmatpush.xpose.msk.msra.mxu3 %vm447_vm2, %v417_v17 }
  0xbd   : > { %736 = vmatpush.xpose.msk.msra.mxu3 %vm447_vm2, %v414_v16 }
  0xc0   : > { %737 = vmatmul.msk.f32.vlgmr.msra.gmra.mxu3 %vm447_vm2, %v384_v18  ;;  %v444_v22 = vpop.f32.mrf.mxu2 }
  0xc1   : > { %504 = vmatpush.msrb.mxu0 %v444_v22  ;;  %739 = vmatpush.msk.msrb.mxu3 %vm530_vm4, %v526_v28 }
  0xc3   : > { %505 = vmatpush.msrb.mxu0 %v441_v21 }
 0x143   : > { %v474_v19 = vpop.f32.mrf.mxu3 }
 0x144   : > { %v478_v20 = vsel %vm477_vm3, %v474_v19, -inf }
 0x145   : > { %479 = vmax.xlane.f32.xlu0 %v478_v20 }
 0x1b8   : > { %v480_v23 = vpop.xlane.xlu0 %479 }
 0x1b9   : > { %v481_v24 = vsub.f32 %v474_v19, %v480_v23 }
 0x1bb   : > { %v482_v25 = vmul.f32 1.442695, %v481_v24 }
 0x1bd   : > { %839 = vpow2.f32 %v482_v25 }
 0x1c3   : > { %v840_v26 = vpop.eup %839 }
 0x1c4   : > { %738 = vmatmul.msk.f32.vlgmr.msrb.gmra.mxu0 %vm477_vm3, %v840_v26  ;;  %v484_v27 = vsel %vm477_vm3, %v840_v26, 0.0 }
 0x1c5   : > { %485 = vadd.xlane.f32.xlu0 %v484_v27 }
 0x238   : > { %v486_v29 = vpop.xlane.xlu0 %485 }
 0x239   : > { %841 = vrcp.f32 %v486_v29  ;;  %v521_v33 = vand.u32 2147483648, %v486_v29  ;;  %v519_v35 = vand.u32 2147483647, %v486_v29  ;;  %vm515_vm6 = vweird.f32 %v486_v29 }
 0x23b   : > { %v522_v37 = vor.u32 1.1754944e-38, %v521_v33  ;;  %vm520_vm8 = vcmp.eq.f32.partialorder %v519_v35, 8.507059e+37 }
 0x23f   : > { %v842_v30 = vpop.eup %841 }
 0x240   : > { %v511_v31 = vmul.f32 %v842_v30, %v486_v29  ;;  %vm516_vm5 = vweird.f32 %v842_v30 }
 0x241   : > { %vm517_vm7 = vmor %vm515_vm6, %vm516_vm5  ;;  %v507_v39 = vpop.f32.mrf.mxu0 }
 0x242   : > { %v512_v32 = vsub.f32 1.0, %v511_v31 }
 0x244   : > { %v513_v34 = vmul.f32 %v842_v30, %v512_v32 }
 0x246   : > { %v514_v36 = vadd.f32 %v842_v30, %v513_v34 }
 0x248   : > { %v518_v38 = vsel %vm517_vm7, %v842_v30, %v514_v36 }
 0x249   : > { %v523_v40 = vsel %vm520_vm8, %v522_v37, %v518_v38 }
 0x24a   : > { %v524_v41 = vmul.f32 %v523_v40, %v507_v39 }
 0x24c   : > { %740 = vmatmul.msk.f32.vlgmr.msrb.gmra.mxu3 %vm447_vm2, %v524_v41 }
 0x2ce   : > { %559 = sbr.rel (%p741_p2) target bundleno = 733 (0x2dd), region = 52 }
 0x2cf   : > { %v551_v43 = vpop.f32.mrf.mxu3 }
 0x2d0   : > { %v554_v44 = vadd.f32 %v551_v43, %v525_v42 }
 0x2d2   : > { %555 = vst.msk [vmem:[#allocation2] sm:$0xff] %vm363_vm1, %v554_v44 }
 0x2d3   : > { %v843_v46 = vld [vmem:[%s1193_s5] ss:$0 sm:$0xff] }
 0x2d9   : > { %v560_v45 = vld [vmem:[#allocation2] sm:$0xff] }
 0x2da   : > { %v565_v47 = vadd.f32 %v843_v46, %v560_v45 }
 0x2dc   : > { %566 = vst.msk [vmem:[%s323_s15] sm:$0xff] %vm363_vm1, %v565_v47 }
 0x2dd PF: > { %s743_s29 = sshll.u32 %s938_s26, 1  ;;  %s582_s24 = sshll.u32 %s323_s15, 4  ;;  %s583_s24 = int_to_ptr.vmem [resolvable:$true] %s582_s24 }
 0x2de   : > { %s578_s30 = sadd.s32 %s934_s25, %s743_s29  ;;  %s1219_s19 = sand.u32 1, %s922_s22  }
 0x2df   : > { %s744_s9 = sshll.u32 %s578_s30, 3  ;;  %s568_s8 = scalar_lea.sflag [#allocation4], %s1219_s19 }
 0x2e0   : > { %s580_s13 = scalar_lea.hbm %s1194_s6, %s744_s9  ;;  %s864_s20 = scalar_lea.hbm %s1194_s6, 32 }
 0x2e1   : > { %s584_s18 = sshll.u32 %s580_s13, 4  ;;  %s585_s18 = int_to_ptr.hbm [resolvable:$true] %s584_s18 }
 0x2e2   : > { %s858_s16 = sshra.s32 %s585_s18, 4  ;;  %s859_s16 = int_to_ptr.hbm [resolvable:$true] %s858_s16 }
 0x2e3   : > { %s860_s17 = scalar_lea.hbm %s859_s16, 8  ;;  %p865_p8 = scmp.lt.s32.totalorder %s859_s16, %s1194_s6 }
 0x2e4   : > { %p861_p3 = scmp.ne.s32.totalorder %s859_s16, %s860_s17  ;;  %p866_p9 = scmp.lt.s32.totalorder %s864_s20, %s860_s17 }
 0x2e6   : > { %p862_p4 = pnand %p861_p3, %p1054_p6  ;;  %p867_p10 = por %p866_p9, %p865_p8 }
 0x2e8   : > { %p863_p5 = pneg %p862_p4 }
 0x2ea   : > { %p868_p11 = pnand %p867_p10, %p863_p5 }
 0x2ec   : > { %871 = shalt.err (!%p868_p11)
}
 0x2ed   : > { %751 = dma.vmem_to_hbm [thread:$0]  (%p1054_p6), %s583_s24, 128, %s585_s18, %s568_s8  }
 0x2ee PF: > { %s1220_s15 = sld [smem:[#allocation11_spill]] }
 0x2ef   : > { %s1221_s23 = sld [smem:[#allocation6_spill]] }
 0x2f4   : > { %p757_p12 = scmp.ge.s32.totalorder %s1220_s15, 2 }
 0x2f5   : > { %s596_s27 = sand.u32 1, %s1221_s23  }
 0x2f6   : > { %p754_p13 = pnand %p757_p12, %p1061_p7  ;;  %s597_s28 = scalar_lea.sflag [#allocation4], %s596_s27 }
 0x2f8   : > { %p755_p0 = pneg %p754_p13 }
 0x2fa   : > { %913 = dma.done.wait (%p755_p0), %s597_s28, 128  }
 0x2fb   : > { %915 = vsyncadd (%p755_p0), %s597_s28, 4294967168  ;;  %s19_s30 = sadd.s32 1, %s1220_s15   ;;  %s1223_s29 = sld [smem:[#allocation7_spill]] }
 0x2fc   : > { %p16_p1 = scmp.ge.s32.totalorder %s19_s30, 34   ;;  %s1224_s23 = sld [smem:[#allocation16_spill]] }
 0x2fd   : > { %s1225_s24 = sld [smem:[#allocation8_spill]]  ;;  %s1231_s21 = smov %s922_s22 }
 0x2fe   : > { %s1226_s25 = sld [smem:[#allocation9_spill]] }
 0x2ff   : > { %s1227_s26 = sld [smem:[#allocation10_spill]] }
 0x300   : > { %s1228_s27 = sld [smem:[#allocation12_spill]] }
 0x301   : > { %s1229_s28 = sld [smem:[#allocation13_spill]]  ;;  %s1232_s22 = smov %s1223_s29 }
 0x302   : > { %s1230_s12 = sld [smem:[#allocation15_spill]] }
 0x304   :  { %18 = sbr.rel (!%p16_p1) target bundleno = 6 (0x6), region = 100 }
 0x308   : > { %s1233_s29 = smov %s1230_s12 }
 0x309   :  { %603 = vsyncpa [#allocation4], 1 }
 0x30a   :  { %605 = vsyncpa [#allocation4 + $0x1], 1 }

</bundles_post_ra>
